<compile_context>
chip_gen: v6e
topology: v6e:2x2x1
jax: 0.10.0
libtpu: 0.0.40
codegen_flags: <defaults>
</compile_context>

<pallas_src>
import jax
import jax.numpy as jnp
from jax.experimental import pallas as pl
from jax.experimental.pallas import tpu as pltpu

BN_EPS = 1e-5
LANES = 128


def _round_up(n, m):
    return ((n + m - 1) // m) * m


# ---------------------------------------------------------------------------
# Fused kernel: pass 0 = batch statistics, pass 1 = recompute + normalize.
# ---------------------------------------------------------------------------
def _make_fused_kernel(inv_b):
    def kernel(x_ref, w_ref, gamma_ref, beta_ref, o_ref, s0_ref, s1_ref):
        p = pl.program_id(0)                 # 0: stats pass, 1: normalize pass
        i = pl.program_id(1)                 # batch tile index
        last_tile = pl.num_programs(1) - 1

        @pl.when(jnp.logical_and(p == 0, i == 0))
        def _init():
            s0_ref[...] = jnp.zeros_like(s0_ref)
            s1_ref[...] = jnp.zeros_like(s1_ref)

        # (TB, rows) @ (rows, 128) -> (TB, 128), f32 accumulation on the MXU.
        # Recomputed in pass 1 instead of round-tripping unnormalized y via HBM.
        y = jnp.dot(x_ref[...], w_ref[...], preferred_element_type=jnp.float32)

        @pl.when(p == 0)
        def _stats():
            # Independent reductions -> overlap on XLU/VPU, single pass over y.
            s0_ref[...] += jnp.sum(y, axis=0, keepdims=True)
            s1_ref[...] += jnp.sum(y * y, axis=0, keepdims=True)

        @pl.when(jnp.logical_and(p == 0, i == last_tile))
        def _fold():
            mean = s0_ref[...] * inv_b
            var = s1_ref[...] * inv_b - mean * mean        # biased var (BN train)
            scale = jax.lax.rsqrt(var + BN_EPS) * gamma_ref[...]
            s0_ref[...] = scale                             # reuse scratch: scale
            s1_ref[...] = beta_ref[...] - mean * scale      # reuse scratch: shift

        @pl.when(p == 1)
        def _normalize():
            o_ref[...] = y * s0_ref[...] + s1_ref[...]

    return kernel


# ---------------------------------------------------------------------------
# Generation-aware VMEM budget (single source of truth for tile sizing and the
# compiler's vmem limit).
# ---------------------------------------------------------------------------
def _vmem_budget_bytes():
    try:
        cap = int(pltpu.get_tpu_info().vmem_capacity_bytes)
    except Exception:
        cap = 64 << 20                     # conservative: v7x physical VMEM
    return int(min(cap // 2, 48 << 20))    # headroom on every generation


def _choose_tile_b(batch, rows, cols_pad, max_tile, x_itemsize, vmem_budget_bytes):
    tb = min(_round_up(batch, 8), _round_up(max_tile, 8))

    def est(t):
        # double-buffered x tile + double-buffered out tile + resident W + slack
        return (2 * t * rows * x_itemsize
                + 2 * t * cols_pad * 4
                + 2 * rows * cols_pad * 4
                + (1 << 20))

    while tb > 8 and est(tb) > vmem_budget_bytes:
        tb = max(8, _round_up(tb // 2, 8))
    return tb


def _regressor_forward(x, W, gamma, beta, *, tile_b=1024):
    """Returns (batchnorm(x @ W), W) — same as the PyTorch module (training mode)."""
    B, rows = x.shape
    cols = W.shape[1]
    cols_pad = _round_up(cols, LANES)       # lane-dense compute width (>= 128)

    # bf16 MXU inputs once the streamed dimension is non-trivial (halves x's
    # HBM bytes, native MXU rate); keep f32 at tiny rows for bit-level fidelity.
    use_bf16 = rows >= 512
    mxu_dtype = jnp.bfloat16 if use_bf16 else jnp.float32
    x_itemsize = 2 if use_bf16 else 4

    W_pad = jnp.pad(W.astype(jnp.float32),
                    ((0, 0), (0, cols_pad - cols))).astype(mxu_dtype)
    gamma_pad = jnp.pad(gamma.astype(jnp.float32).reshape(1, cols),
                        ((0, 0), (0, cols_pad - cols)))
    beta_pad = jnp.pad(beta.astype(jnp.float32).reshape(1, cols),
                       ((0, 0), (0, cols_pad - cols)))

    vmem_budget = _vmem_budget_bytes()
    TB = _choose_tile_b(B, rows, cols_pad, tile_b, x_itemsize, vmem_budget)
    B_pad = _round_up(B, TB)
    x_pad = x.astype(mxu_dtype)
    if B_pad != B:
        # Zero rows contribute nothing to sum / sum-of-squares; we divide by B.
        x_pad = jnp.pad(x_pad, ((0, B_pad - B), (0, 0)))
    num_tiles = B_pad // TB

    kernel = _make_fused_kernel(1.0 / B)

    x_bytes = B_pad * rows * x_itemsize
    cost = pl.CostEstimate(
        flops=2 * (2 * B_pad * rows * cols_pad),              # matmul done twice
        transcendentals=0,
        bytes_accessed=2 * x_bytes + B_pad * cols_pad * 4
        + rows * cols_pad * x_itemsize + 2 * cols_pad * 4,
    )

    y_pad = pl.pallas_call(
        kernel,
        out_shape=jax.ShapeDtypeStruct((B_pad, cols_pad), jnp.float32),
        grid_spec=pltpu.PrefetchScalarGridSpec(
            num_scalar_prefetch=0,
            grid=(2, num_tiles),                              # (pass, batch tile)
            in_specs=[
                pl.BlockSpec((TB, rows), lambda p, i: (i, 0)),
                pl.BlockSpec((rows, cols_pad), lambda p, i: (0, 0)),
                pl.BlockSpec((1, cols_pad), lambda p, i: (0, 0)),
                pl.BlockSpec((1, cols_pad), lambda p, i: (0, 0)),
            ],
            # During the stats pass the output block index is pinned to 0, so the
            # never-written buffer is not flushed to HBM; each tile is written
            # exactly once, after pass 1 fills it with normalized values.
            out_specs=pl.BlockSpec((TB, cols_pad), lambda p, i: (p * i, 0)),
            scratch_shapes=[
                pltpu.VMEM((1, cols_pad), jnp.float32),       # sum  -> scale
                pltpu.VMEM((1, cols_pad), jnp.float32),       # ssq  -> shift
            ],
        ),
        compiler_params=pltpu.CompilerParams(
            # Stats accumulate sequentially over tiles and the pass axis is a
            # true dependency -> both axes "arbitrary".
            dimension_semantics=("arbitrary", "arbitrary"),
            vmem_limit_bytes=vmem_budget,
        ),
        cost_estimate=cost,
    )(x_pad, W_pad, gamma_pad, beta_pad)

    # Lane-dense (B_pad, 128) kept for unmasked full-width stores; slice off the
    # real columns / batch rows here.
    return y_pad[:B, :cols], W


regressor_forward = jax.jit(_regressor_forward, static_argnames=("tile_b",))


def make_orthogonal(key, rows, cols, dtype=jnp.float32):
    """Deterministic stand-in for nn.init.orthogonal_ (QR of a Gaussian matrix)."""
    a = jax.random.normal(key, (max(rows, cols), min(rows, cols)), dtype=jnp.float32)
    q, r = jnp.linalg.qr(a)
    q = q * jnp.sign(jnp.diag(r))[None, :]
    if rows < cols:
        q = q.T
    return q[:rows, :cols].astype(dtype)


if __name__ == "__main__":
    # Small shapes consistent with the module: BatchNorm1d(6) forces columns = 6.
    B, ROWS, COLS = 8, 32, 6

    key = jax.random.PRNGKey(0)
    kx, kw = jax.random.split(key)

    x = jax.random.normal(kx, (B, ROWS), dtype=jnp.float32)
    W = make_orthogonal(kw, ROWS, COLS)            # nn.init.orthogonal_(W)
    gamma = jnp.ones((COLS,), dtype=jnp.float32)   # BatchNorm1d weight init
    beta = jnp.zeros((COLS,), dtype=jnp.float32)   # BatchNorm1d bias init

    y, W_out = regressor_forward(x, W, gamma, beta)
    jax.block_until_ready((y, W_out))

    # Sanity check against a pure-JAX reference of the same math.
    y_ref = x @ W
    mu = y_ref.mean(axis=0, keepdims=True)
    var = ((y_ref - mu) ** 2).mean(axis=0, keepdims=True)
    y_ref = (y_ref - mu) / jnp.sqrt(var + BN_EPS) * gamma + beta
    assert y.shape == (B, COLS)
    assert jnp.allclose(y, y_ref, atol=1e-4, rtol=1e-4)
    assert jnp.allclose(W_out, W)

    print("KERNEL_OK")
</pallas_src>

<mosaic_0001>
module attributes {stable_mosaic.version = 11 : i64} {
  func.func @kernel(%arg0: i32, %arg1: i32, %arg2: memref<8x32xf32, #tpu.memory_space<vmem>>, %arg3: memref<32x128xf32, #tpu.memory_space<vmem>>, %arg4: memref<1x128xf32, #tpu.memory_space<vmem>>, %arg5: memref<1x128xf32, #tpu.memory_space<vmem>>, %arg6: memref<8x128xf32, #tpu.memory_space<vmem>>, %arg7: memref<1x128xf32, #tpu.memory_space<vmem>>, %arg8: memref<1x128xf32, #tpu.memory_space<vmem>>) attributes {dimension_semantics = [#tpu.dimension_semantics<arbitrary>, #tpu.dimension_semantics<arbitrary>], iteration_bounds = array<i64: 2, 1>, scalar_prefetch = 0 : i64, scratch_operands = 2 : i64, tpu.core_type = #tpu.core_type<tc>, window_params = [{transform_indices = @transform_0, window_bounds = array<i64: 8, 32>}, {pipeline_mode = #tpu.pipeline_mode<synchronous>, transform_indices = @transform_1, window_bounds = array<i64: 32, 128>}, {pipeline_mode = #tpu.pipeline_mode<synchronous>, transform_indices = @transform_2, window_bounds = array<i64: 1, 128>}, {pipeline_mode = #tpu.pipeline_mode<synchronous>, transform_indices = @transform_3, window_bounds = array<i64: 1, 128>}, {transform_indices = @transform_4, window_bounds = array<i64: 8, 128>}]} {
    %c0_i32 = arith.constant 0 : i32
    %0 = arith.cmpi eq, %arg0, %c0_i32 : i32
    %c0_i32_0 = arith.constant 0 : i32
    %1 = arith.cmpi eq, %arg1, %c0_i32_0 : i32
    %2 = arith.andi %0, %1 : i1
    %3 = arith.extui %2 : i1 to i32
    %c0_i32_1 = arith.constant 0 : i32
    %4 = arith.cmpi ne, %3, %c0_i32_1 : i32
    scf.if %4 {
      %cst_11 = arith.constant 0.000000e+00 : f32
      %19 = vector.broadcast %cst_11 : f32 to vector<1x128xf32>
      %c0_12 = arith.constant 0 : index
      %c0_13 = arith.constant 0 : index
      %20 = vector.load %arg7[%c0_12, %c0_13] : memref<1x128xf32, #tpu.memory_space<vmem>>, vector<1x128xf32>
      tpu.vector_store %arg7[%c0_12, %c0_13], %19 {strides = array<i32>} : memref<1x128xf32, #tpu.memory_space<vmem>>, vector<1x128xf32>,
      %cst_14 = arith.constant 0.000000e+00 : f32
      %21 = vector.broadcast %cst_14 : f32 to vector<1x128xf32>
      %c0_15 = arith.constant 0 : index
      %c0_16 = arith.constant 0 : index
      %22 = vector.load %arg8[%c0_15, %c0_16] : memref<1x128xf32, #tpu.memory_space<vmem>>, vector<1x128xf32>
      tpu.vector_store %arg8[%c0_15, %c0_16], %21 {strides = array<i32>} : memref<1x128xf32, #tpu.memory_space<vmem>>, vector<1x128xf32>,
    } else {
    }
    %c0 = arith.constant 0 : index
    %c0_2 = arith.constant 0 : index
    %5 = vector.load %arg2[%c0, %c0_2] : memref<8x32xf32, #tpu.memory_space<vmem>>, vector<8x32xf32>
    %c0_3 = arith.constant 0 : index
    %c0_4 = arith.constant 0 : index
    %6 = vector.load %arg3[%c0_3, %c0_4] : memref<32x128xf32, #tpu.memory_space<vmem>>, vector<32x128xf32>
    %cst = arith.constant dense<0.000000e+00> : vector<8x128xf32>
    %7 = tpu.matmul %5, %6, %cst {dimension_numbers = #tpu.dot_dimension_numbers<[1], [0], [0], [1], [0, 0, 1, 1], [], []>} : vector<8x32xf32>, vector<32x128xf32>, vector<8x128xf32> -> vector<8x128xf32>
    %c0_i32_5 = arith.constant 0 : i32
    %8 = arith.cmpi eq, %arg0, %c0_i32_5 : i32
    %9 = arith.extui %8 : i1 to i32
    %c0_i32_6 = arith.constant 0 : i32
    %10 = arith.cmpi ne, %9, %c0_i32_6 : i32
    scf.if %10 {
      %c0_11 = arith.constant 0 : index
      %c0_12 = arith.constant 0 : index
      %19 = vector.load %arg7[%c0_11, %c0_12] : memref<1x128xf32, #tpu.memory_space<vmem>>, vector<1x128xf32>
      %cst_13 = arith.constant dense<0.000000e+00> : vector<128xf32>
      %20 = vector.multi_reduction <add>, %7, %cst_13 [0] : vector<8x128xf32> to vector<128xf32>
      %21 = vector.shape_cast %20 : vector<128xf32> to vector<1x128xf32>
      %22 = arith.addf %19, %21 : vector<1x128xf32>
      %c0_14 = arith.constant 0 : index
      %c0_15 = arith.constant 0 : index
      %23 = vector.load %arg7[%c0_14, %c0_15] : memref<1x128xf32, #tpu.memory_space<vmem>>, vector<1x128xf32>
      tpu.vector_store %arg7[%c0_14, %c0_15], %22 {strides = array<i32>} : memref<1x128xf32, #tpu.memory_space<vmem>>, vector<1x128xf32>,
      %c0_16 = arith.constant 0 : index
      %c0_17 = arith.constant 0 : index
      %24 = vector.load %arg8[%c0_16, %c0_17] : memref<1x128xf32, #tpu.memory_space<vmem>>, vector<1x128xf32>
      %25 = arith.mulf %7, %7 : vector<8x128xf32>
      %cst_18 = arith.constant dense<0.000000e+00> : vector<128xf32>
      %26 = vector.multi_reduction <add>, %25, %cst_18 [0] : vector<8x128xf32> to vector<128xf32>
      %27 = vector.shape_cast %26 : vector<128xf32> to vector<1x128xf32>
      %28 = arith.addf %24, %27 : vector<1x128xf32>
      %c0_19 = arith.constant 0 : index
      %c0_20 = arith.constant 0 : index
      %29 = vector.load %arg8[%c0_19, %c0_20] : memref<1x128xf32, #tpu.memory_space<vmem>>, vector<1x128xf32>
      tpu.vector_store %arg8[%c0_19, %c0_20], %28 {strides = array<i32>} : memref<1x128xf32, #tpu.memory_space<vmem>>, vector<1x128xf32>,
    } else {
    }
    %c0_i32_7 = arith.constant 0 : i32
    %11 = arith.cmpi eq, %arg0, %c0_i32_7 : i32
    %c0_i32_8 = arith.constant 0 : i32
    %12 = arith.cmpi eq, %arg1, %c0_i32_8 : i32
    %13 = arith.andi %11, %12 : i1
    %14 = arith.extui %13 : i1 to i32
    %c0_i32_9 = arith.constant 0 : i32
    %15 = arith.cmpi ne, %14, %c0_i32_9 : i32
    scf.if %15 {
      %c0_11 = arith.constant 0 : index
      %c0_12 = arith.constant 0 : index
      %19 = vector.load %arg7[%c0_11, %c0_12] : memref<1x128xf32, #tpu.memory_space<vmem>>, vector<1x128xf32>
      %cst_13 = arith.constant 1.250000e-01 : f32
      %20 = vector.broadcast %cst_13 : f32 to vector<1x128xf32>
      %21 = arith.mulf %19, %20 : vector<1x128xf32>
      %c0_14 = arith.constant 0 : index
      %c0_15 = arith.constant 0 : index
      %22 = vector.load %arg8[%c0_14, %c0_15] : memref<1x128xf32, #tpu.memory_space<vmem>>, vector<1x128xf32>
      %cst_16 = arith.constant 1.250000e-01 : f32
      %23 = vector.broadcast %cst_16 : f32 to vector<1x128xf32>
      %24 = arith.mulf %22, %23 : vector<1x128xf32>
      %25 = arith.mulf %21, %21 : vector<1x128xf32>
      %26 = arith.subf %24, %25 : vector<1x128xf32>
      %cst_17 = arith.constant 9.99999974E-6 : f32
      %27 = vector.broadcast %cst_17 : f32 to vector<1x128xf32>
      %28 = arith.addf %26, %27 : vector<1x128xf32>
      %29 = math.rsqrt %28 : vector<1x128xf32>
      %c0_18 = arith.constant 0 : index
      %c0_19 = arith.constant 0 : index
      %30 = vector.load %arg4[%c0_18, %c0_19] : memref<1x128xf32, #tpu.memory_space<vmem>>, vector<1x128xf32>
      %31 = arith.mulf %29, %30 : vector<1x128xf32>
      %c0_20 = arith.constant 0 : index
      %c0_21 = arith.constant 0 : index
      %32 = vector.load %arg7[%c0_20, %c0_21] : memref<1x128xf32, #tpu.memory_space<vmem>>, vector<1x128xf32>
      tpu.vector_store %arg7[%c0_20, %c0_21], %31 {strides = array<i32>} : memref<1x128xf32, #tpu.memory_space<vmem>>, vector<1x128xf32>,
      %c0_22 = arith.constant 0 : index
      %c0_23 = arith.constant 0 : index
      %33 = vector.load %arg5[%c0_22, %c0_23] : memref<1x128xf32, #tpu.memory_space<vmem>>, vector<1x128xf32>
      %34 = arith.mulf %21, %31 : vector<1x128xf32>
      %35 = arith.subf %33, %34 : vector<1x128xf32>
      %c0_24 = arith.constant 0 : index
      %c0_25 = arith.constant 0 : index
      %36 = vector.load %arg8[%c0_24, %c0_25] : memref<1x128xf32, #tpu.memory_space<vmem>>, vector<1x128xf32>
      tpu.vector_store %arg8[%c0_24, %c0_25], %35 {strides = array<i32>} : memref<1x128xf32, #tpu.memory_space<vmem>>, vector<1x128xf32>,
    } else {
    }
    %c1_i32 = arith.constant 1 : i32
    %16 = arith.cmpi eq, %arg0, %c1_i32 : i32
    %17 = arith.extui %16 : i1 to i32
    %c0_i32_10 = arith.constant 0 : i32
    %18 = arith.cmpi ne, %17, %c0_i32_10 : i32
    scf.if %18 {
      %c0_11 = arith.constant 0 : index
      %c0_12 = arith.constant 0 : index
      %19 = vector.load %arg7[%c0_11, %c0_12] : memref<1x128xf32, #tpu.memory_space<vmem>>, vector<1x128xf32>
      %20 = vector.broadcast %19 : vector<1x128xf32> to vector<8x128xf32>
      %21 = arith.mulf %7, %20 : vector<8x128xf32>
      %c0_13 = arith.constant 0 : index
      %c0_14 = arith.constant 0 : index
      %22 = vector.load %arg8[%c0_13, %c0_14] : memref<1x128xf32, #tpu.memory_space<vmem>>, vector<1x128xf32>
      %23 = vector.broadcast %22 : vector<1x128xf32> to vector<8x128xf32>
      %24 = arith.addf %21, %23 : vector<8x128xf32>
      %c0_15 = arith.constant 0 : index
      %c0_16 = arith.constant 0 : index
      %25 = vector.load %arg6[%c0_15, %c0_16] : memref<8x128xf32, #tpu.memory_space<vmem>>, vector<8x128xf32>
      tpu.vector_store %arg6[%c0_15, %c0_16], %24 {strides = array<i32>} : memref<8x128xf32, #tpu.memory_space<vmem>>, vector<8x128xf32>,
    } else {
    }
    return
  }
  func.func @transform_0(%arg0: i32, %arg1: i32) -> (i32, i32) {
    %c0_i32 = arith.constant 0 : i32
    %c0_i32_0 = arith.constant 0 : i32
    return %arg1, %c0_i32 : i32, i32
  }
  func.func @transform_1(%arg0: i32, %arg1: i32) -> (i32, i32) {
    %c0_i32 = arith.constant 0 : i32
    %c0_i32_0 = arith.constant 0 : i32
    %c0_i32_1 = arith.constant 0 : i32
    return %c0_i32, %c0_i32_0 : i32, i32
  }
  func.func @transform_2(%arg0: i32, %arg1: i32) -> (i32, i32) {
    %c0_i32 = arith.constant 0 : i32
    %c0_i32_0 = arith.constant 0 : i32
    %c0_i32_1 = arith.constant 0 : i32
    return %c0_i32, %c0_i32_0 : i32, i32
  }
  func.func @transform_3(%arg0: i32, %arg1: i32) -> (i32, i32) {
    %c0_i32 = arith.constant 0 : i32
    %c0_i32_0 = arith.constant 0 : i32
    %c0_i32_1 = arith.constant 0 : i32
    return %c0_i32, %c0_i32_0 : i32, i32
  }
  func.func @transform_4(%arg0: i32, %arg1: i32) -> (i32, i32) {
    %0 = arith.muli %arg0, %arg1 : i32
    %c0_i32 = arith.constant 0 : i32
    %c0_i32_0 = arith.constant 0 : i32
    return %0, %c0_i32 : i32, i32
  }
}

</mosaic_0001>

<bundles_post_ra>
// kernel: _regressor_forward.1
= control target key start
LH: loop header
LB: loop body
LE: loop exit
PB: predicated region body
PF: predicated region fallthrough
CT: control target
= control target key end

     0   :  { %9 = vsyncpa [#allocation5], 0  ;;  %s669_s0 = inlined_call_operand.vmem [shape: f32[8,32], index: 0, kind: input, shape index: {}]   ;;  %s670_s1 = inlined_call_operand.vmem [shape: f32[32,128], index: 1, kind: input, shape index: {}]   ;;  %s671_s2 = inlined_call_operand.vmem [shape: f32[1,128], index: 2, kind: input, shape index: {}]   ;;  %s672_s3 = inlined_call_operand.vmem [shape: f32[1,128], index: 3, kind: input, shape index: {}]   ;;  %s673_s4 = inlined_call_operand.hbm [shape: f32[8,128], index: 4, kind: output, shape index: {}]  }
   0x1   :  { %11 = vsyncpa [#allocation5 + $0x1], 0  ;;  %s594_s15 = smov 0   ;;  %s596_s16 = smov 0  }
   0x2   :  { %s598_s17 = smov 0  }
   0x3 LB: > { %s440_s18 = sadd.s32 4294967295, %s563_s17   ;;  %s441_s19 = sadd.s32 4294967294, %s563_s17   ;;  %s563_s17 = sphi %s598_s17, %s17_s17   ;;  %s559_s16 = sphi %s596_s16, %s676_s16   ;;  %s555_s15 = sphi %s594_s15, %s675_s15  }
   0x4   : > { %s29_s20 = sadd.s32 1, %s559_s16  ;;  %p444_p0 = scmp.ge.s32.totalorder %s563_s17, 1 }
   0x5   : > { %p31_p1 = scmp.ge.s32.totalorder %s29_s20, 2  ;;  %p178_p2 = scmp.lt.s32.totalorder %s563_s17, 3 }
   0x7   : > { %s678_s20 = smov (%p31_p1, %s29_s20), 0  ;;  %p179_p3 = pnand %p444_p0, %p178_p2 }
   0x8   : > { %p208_p4 = scmp.eq.s32.totalorder (!%p179_p3), %s555_s15, 0 }
   0x9   : > { %182 = sbr.rel (%p179_p3) target bundleno = 300 (0x12c), region = 36 }
   0xe   : > { %213 = sbr.rel (!%p208_p4) target bundleno = 19 (0x13), region = 40  ;;  %v565_v0 = vmov (%p208_p4), 0.0  }
   0xf   : > { %214 = vst [vmem:[#allocation2] sm:$0x1] (%p208_p4), %v565_v0  ;;  %215 = vst [vmem:[#allocation3] sm:$0x1] (%p208_p4), %v565_v0 }
  0x13 PF: > { %v220_v1 = vld [vmem:[%s670_s1 + $0x18] sm:$0xff]  ;;  %v566_v2 = vmov 0.0   ;;  %v219_v3 = vld [vmem:[%s670_s1 + $0x10] sm:$0xff]  ;;  %vm567_vm0 = vmmov 0   ;;  %v218_v4 = vld [vmem:[%s670_s1 + $0x8] sm:$0xff]  ;;  %vm221_vm1 = vcmask 261120  }
  0x14   : > { %461 = vmatprep.subr.mxu0 %v566_v2  ;;  %469 = vmatprep.mubr.msk.f32.mxu0 %vm567_vm0, %v566_v2  ;;  %v217_v5 = vld [vmem:[%s670_s1] sm:$0xff]  ;;  %p447_p5 = scmp.ne.s32.totalorder %s555_s15, 0 }
  0x15   : > { %462 = vmatpush3.msra.mxu0 %v220_v1  ;;  %v216_v6 = vld [vmem:[%s669_s0] sm:$0xff] }
  0x16   : > { %463 = vmatprep.subr.mxu0 %v566_v2 }
  0x17   : > { %464 = vmatpush3.msra.mxu0 %v219_v3 }
  0x18   : > { %465 = vmatprep.subr.mxu0 %v566_v2 }
  0x19   : > { %466 = vmatpush3.msra.mxu0 %v218_v4 }
  0x1a   : > { %467 = vmatprep.subr.mxu0 %v566_v2 }
  0x1b   : > { %468 = vmatpush3.msra.mxu0 %v217_v5 }
  0x1c   : > { %470 = vmatmul.mubr.msk.f32.vlgmr.msra.gmra.mxu0 %vm221_vm1, %v216_v6 }
  0xda   : > { %297 = sbr.rel (%p447_p5) target bundleno = 240 (0xf0), region = 44 }
  0xdc   : > { %v291_v7 = vpop.f32.mrf.mxu0 }
  0xde   : > { %v471_v8 = vpop.f32.mrf.mxu0 }
  0xdf   : > { %v299_v9 = vrot.slane %v291_v7, 4  ;;  %v308_v10 = vmul.f32 %v291_v7, %v291_v7  ;;  %v298_v19 = vld [vmem:[#allocation2] sm:$0x1]  ;;  %v307_v22 = vld [vmem:[#allocation3] sm:$0x1] }
  0xe1   : > { %v300_v11 = vadd.f32 %v299_v9, %v291_v7  ;;  %v309_v12 = vrot.slane %v308_v10, 4 }
  0xe3   : > { %v301_v13 = vrot.slane %v300_v11, 2  ;;  %v310_v14 = vadd.f32 %v309_v12, %v308_v10 }
  0xe5   : > { %v302_v15 = vadd.f32 %v301_v13, %v300_v11  ;;  %v311_v16 = vrot.slane %v310_v14, 2 }
  0xe7   : > { %v303_v17 = vrot.slane %v302_v15, 1  ;;  %v312_v18 = vadd.f32 %v311_v16, %v310_v14 }
  0xe9   : > { %v304_v20 = vadd.f32 %v303_v17, %v302_v15  ;;  %v313_v21 = vrot.slane %v312_v18, 1 }
  0xeb   : > { %v305_v23 = vadd.f32 %v304_v20, %v298_v19  ;;  %v314_v24 = vadd.f32 %v313_v21, %v312_v18 }
  0xed   : > { %306 = vst [vmem:[#allocation2] sm:$0x1] %v305_v23  ;;  %v315_v25 = vadd.f32 %v314_v24, %v307_v22 }
  0xef   : > { %316 = vst [vmem:[#allocation3] sm:$0x1] %v315_v25 }
  0xf0 PF: > { %318 = sbr.rel (!%p208_p4) target bundleno = 274 (0x112), region = 48  ;;  %v327_v33 = vld [vmem:[%s671_s2] sm:$0x1] (%p208_p4) }
  0xf1   : > { %v330_v36 = vld [vmem:[%s672_s3] sm:$0x1] (%p208_p4) }
  0xf4   : > { %v319_v26 = vld [vmem:[#allocation2] sm:$0x1] (%p208_p4) }
  0xf5   : > { %v320_v28 = vmul.f32 0.125, %v319_v26 }
  0xf6   : > { %v321_v27 = vld [vmem:[#allocation3] sm:$0x1] }
  0xf7   : > { %v322_v29 = vmul.f32 0.125, %v321_v27  ;;  %v323_v30 = vmul.f32 %v320_v28, %v320_v28 }
  0xf9   : > { %v324_v31 = vsub.f32 %v322_v29, %v323_v30 }
  0xfb   : > { %v325_v32 = vadd.f32 1e-05, %v324_v31 }
  0xfd   : > { %511 = vrsqrt.f32 %v325_v32 }
 0x10a   : > { %v512_v34 = vpop.eup %511 }
 0x10b   : > { %v328_v35 = vmul.f32 %v512_v34, %v327_v33 }
 0x10d   : > { %329 = vst [vmem:[#allocation2] sm:$0x1] %v328_v35  ;;  %v331_v37 = vmul.f32 %v328_v35, %v320_v28 }
 0x10f   : > { %v332_v38 = vsub.f32 %v330_v36, %v331_v37 }
 0x111   : > { %333 = vst [vmem:[#allocation3] sm:$0x1] %v332_v38 }
 0x112 PF: > { %p448_p6 = scmp.ne.s32.totalorder %s555_s15, 1 }
 0x114   : > { %337 = sbr.rel (%p448_p6) target bundleno = 287 (0x11f), region = 52 }
 0x119   : > { %v449_v39 = vld [vmem:[#allocation2] ss:$0 sm:$0xff]  ;;  %v450_v40 = vld [vmem:[#allocation3] ss:$0 sm:$0xff] }
 0x11a   : > { %v345_v41 = vmul.f32 %v449_v39, %v291_v7 }
 0x11c   : > { %v353_v42 = vadd.f32 %v450_v40, %v345_v41 }
 0x11e   : > { %354 = vst [vmem:[#allocation4] sm:$0xff] %v353_v42 }
 0x11f PF: > { %p646_p7 = scmp.eq.s32.totalorder %s440_s18, 1  ;;  %s568_s10 = smov [#allocation4]  }
 0x120   : > { %s370_s11 = sshll.u32 %s568_s10, 4  ;;  %s371_s11 = int_to_ptr.vmem [resolvable:$true] %s370_s11 }
 0x121   : > { %s513_s12 = scalar_lea.vmem %s371_s11, 128  ;;  %s519_s13 = scalar_lea.vmem %s371_s11, 256 }
 0x122   : > { %p514_p8 = scmp.ne.s32.totalorder %s371_s11, %s513_s12  ;;  %p520_p11 = scmp.lt.s32.totalorder %s371_s11, %s371_s11 }
 0x123   : > { %p521_p12 = scmp.lt.s32.totalorder %s519_s13, %s513_s12 }
 0x124   : > { %p515_p9 = pnand %p514_p8, %p646_p7 }
 0x125   : > { %p522_p13 = por %p521_p12, %p520_p11 }
 0x126   : > { %p516_p10 = pneg %p515_p9 }
 0x128   : > { %p523_p0 = pnand %p522_p13, %p516_p10 }
 0x12a   : > { %526 = shalt.err (!%p523_p0)
}
 0x12b   : > { %473 = dma.vmem_to_hbm [thread:$0]  (%p646_p7), %s371_s11, 128, %s673_s4, [#allocation5]  }
 0x12c PF: > { %p481_p1 = scmp.ge.s32.totalorder %s563_s17, 2  ;;  %p482_p2 = scmp.eq.s32.totalorder %s441_s19, 1 }
 0x12e   : > { %p477_p3 = pnand %p482_p2, %p481_p1 }
 0x130   : > { %p478_p4 = pneg %p477_p3 }
 0x132   : > { %550 = dma.done.wait (%p478_p4), [#allocation5], 128  }
 0x133   : > { %552 = vsyncadd (%p478_p4), [#allocation5], 4294967168  ;;  %s17_s17 = sadd.s32 1, %s563_s17   ;;  %s675_s15 = smov %s559_s16 }
 0x134   : > { %p14_p5 = scmp.ge.s32.totalorder %s17_s17, 4   ;;  %s676_s16 = smov %s678_s20 }
 0x136   :  { %16 = sbr.rel (!%p14_p5) target bundleno = 3 (0x3), region = 87 }
 0x13b   :  { %388 = vsyncpa [#allocation5], 1 }
 0x13c   :  { %390 = vsyncpa [#allocation5 + $0x1], 1 }

</bundles_post_ra>
